<compile_context>
chip_gen: v6e
topology: v6e:2x2x1
jax: 0.10.0
libtpu: 0.0.40
codegen_flags: <defaults>
</compile_context>

<pallas_src>
import jax
import jax.numpy as jnp
from jax.experimental import pallas as pl
from jax.experimental.pallas import tpu as pltpu

_LANES = 128
_MIB = 1024 * 1024
_FALLBACK_VMEM_BYTES = 64 * _MIB   # v7x per-TC VMEM; safe lower bound everywhere
_MAX_BLOCK_BYTES = 16 * _MIB       # cap even on 128-MiB-VMEM chips (v5e/v6e)


def _ceil_kernel(x_ref, o_ref):
    # Elementwise ceil on the whole VMEM tile (single VPU op per vreg).
    o_ref[...] = jnp.ceil(x_ref[...])


def _vmem_capacity_bytes() -> int:
    """Trace-time VMEM capacity query with a conservative fallback."""
    try:
        info = pltpu.get_tpu_info()
        for name in ("vmem_capacity_bytes", "vmem_size_bytes", "vmem_bytes"):
            cap = getattr(info, name, None)
            if cap:
                return int(cap)
    except Exception:
        pass
    return _FALLBACK_VMEM_BYTES


def _sublane_multiple(dtype) -> int:
    # 8 sublanes for 4-byte, 16 for 2-byte, 32 for 1-byte dtypes.
    itemsize = jnp.dtype(dtype).itemsize
    return max(8, 32 // max(itemsize, 1))


def _choose_width(n_padded: int) -> int:
    # Widest lane-dense width that divides the (128-aligned) size and still
    # leaves at least 8 rows; fall back to 128.
    for w in (1024, 512, 256, 128):
        if n_padded % w == 0 and n_padded // w >= 8:
            return w
    return _LANES


def ceil_pallas(x: jax.Array, donate_input: bool = False) -> jax.Array:
    """Elementwise ceil, matching torch.Tensor.ceil() forward semantics."""
    orig_shape = x.shape
    dtype = x.dtype

    if not jnp.issubdtype(dtype, jnp.floating):
        # torch.ceil raises on integral tensors; identity is a benign superset.
        return x

    if jnp.dtype(dtype) not in (
        jnp.dtype(jnp.float32),
        jnp.dtype(jnp.bfloat16),
        jnp.dtype(jnp.float16),
    ):
        # float64 / fp8 etc.: no clean TPU Pallas lowering; let XLA handle it.
        return jnp.ceil(x)

    n = x.size
    if n == 0:
        return x

    x_flat = x.reshape(-1)

    # Minimal padding: only up to the next multiple of the lane width
    # (<= 127 elements). The common case pads nothing -> pure reshape.
    n_pad = (-n) % _LANES
    if n_pad:
        x_flat = jnp.pad(x_flat, (0, n_pad))
    n_padded = n + n_pad

    width = _choose_width(n_padded)
    rows = n_padded // width

    sub = _sublane_multiple(dtype)
    itemsize = jnp.dtype(dtype).itemsize

    # Generation-aware block sizing: in + out, each double-buffered -> ~4x the
    # block bytes of pipeline VMEM. 64 MiB VMEM (v7x) -> 8 MiB blocks;
    # 128 MiB VMEM (v5e/v6e) -> 16 MiB blocks.
    vmem_cap = _vmem_capacity_bytes()
    block_bytes = max(_MIB, min(vmem_cap // 8, _MAX_BLOCK_BYTES))
    vmem_limit = int(min(4 * block_bytes + 8 * _MIB, vmem_cap - 8 * _MIB))

    target_rows = max(sub, (block_bytes // (width * itemsize)) // sub * sub)

    if rows <= target_rows:
        # One block covering the full array (full-extent dims are allowed even
        # when rows is not a multiple of the sublane packing). No forced split:
        # single-TC chips gain nothing from extra serial grid steps.
        tile_rows = rows
    else:
        # Multiple blocks are needed anyway: aim for >= 4 pipeline steps so the
        # double-buffered DMA stream reaches steady state and both v7x cores
        # get >= 2 blocks; the ragged last block is masked by Pallas.
        quarter = -(-rows // 4)                 # ceil(rows / 4)
        quarter = -(-quarter // sub) * sub      # round up to sublane multiple
        tile_rows = min(target_rows, max(quarter, sub))

    grid = (pl.cdiv(rows, tile_rows),)

    x2d = x_flat.reshape(rows, width)

    out2d = pl.pallas_call(
        _ceil_kernel,
        out_shape=jax.ShapeDtypeStruct((rows, width), dtype),
        grid_spec=pltpu.PrefetchScalarGridSpec(
            num_scalar_prefetch=0,
            grid=grid,
            in_specs=[pl.BlockSpec((tile_rows, width), lambda i: (i, 0))],
            out_specs=pl.BlockSpec((tile_rows, width), lambda i: (i, 0)),
        ),
        compiler_params=pltpu.CompilerParams(
            dimension_semantics=("parallel",),
            vmem_limit_bytes=vmem_limit,
        ),
        cost_estimate=pl.CostEstimate(
            flops=int(n_padded),
            transcendentals=0,
            bytes_accessed=int(2 * n_padded * itemsize),
        ),
        input_output_aliases=({0: 0} if donate_input else {}),
    )(x2d)

    out_flat = out2d.reshape(-1)
    if n_pad:
        out_flat = out_flat[:n]
    return out_flat.reshape(orig_shape)


if __name__ == "__main__":
    key = jax.random.PRNGKey(0)

    # NCHW input, small shapes: batch=2, channels=4, spatial=16x16.
    x = jax.random.normal(key, (2, 4, 16, 16), dtype=jnp.float32) * 3.0
    y = ceil_pallas(x)
    jax.block_until_ready(y)
    y_ref = jnp.ceil(x)
    assert y.shape == x.shape and y.dtype == x.dtype
    assert bool(jnp.all(y == y_ref))

    # Awkward size to exercise the minimal-pad + ragged-last-block path.
    x2 = jax.random.normal(jax.random.PRNGKey(1), (3, 5, 7, 11), dtype=jnp.float32) * 5.0
    y2 = ceil_pallas(x2)
    jax.block_until_ready(y2)
    assert bool(jnp.all(y2 == jnp.ceil(x2)))

    # bf16 path (different sublane packing).
    x3 = (jax.random.normal(jax.random.PRNGKey(2), (2, 4, 16, 16)) * 3.0).astype(jnp.bfloat16)
    y3 = ceil_pallas(x3)
    jax.block_until_ready(y3)
    assert y3.dtype == jnp.bfloat16
    assert bool(jnp.all(y3 == jnp.ceil(x3)))

    print("KERNEL_OK")
</pallas_src>

<mosaic_0001>
module attributes {stable_mosaic.version = 11 : i64} {
  func.func @_ceil_kernel(%arg0: i32, %arg1: memref<8x256xf32, #tpu.memory_space<vmem>>, %arg2: memref<8x256xf32, #tpu.memory_space<vmem>>) attributes {dimension_semantics = [#tpu.dimension_semantics<parallel>], iteration_bounds = array<i64: 1>, scalar_prefetch = 0 : i64, scratch_operands = 0 : i64, tpu.core_type = #tpu.core_type<tc>, window_params = [{transform_indices = @transform_0, window_bounds = array<i64: 8, 256>}, {transform_indices = @transform_1, window_bounds = array<i64: 8, 256>}]} {
    %c0 = arith.constant 0 : index
    %c0_0 = arith.constant 0 : index
    %0 = vector.load %arg1[%c0, %c0_0] : memref<8x256xf32, #tpu.memory_space<vmem>>, vector<8x256xf32>
    %1 = math.ceil %0 : vector<8x256xf32>
    %c0_1 = arith.constant 0 : index
    %c0_2 = arith.constant 0 : index
    %2 = vector.load %arg2[%c0_1, %c0_2] : memref<8x256xf32, #tpu.memory_space<vmem>>, vector<8x256xf32>
    tpu.vector_store %arg2[%c0_1, %c0_2], %1 {strides = array<i32>} : memref<8x256xf32, #tpu.memory_space<vmem>>, vector<8x256xf32>,
    return
  }
  func.func @transform_0(%arg0: i32) -> (i32, i32) {
    %c0_i32 = arith.constant 0 : i32
    %c0_i32_0 = arith.constant 0 : i32
    return %arg0, %c0_i32 : i32, i32
  }
  func.func @transform_1(%arg0: i32) -> (i32, i32) {
    %c0_i32 = arith.constant 0 : i32
    %c0_i32_0 = arith.constant 0 : i32
    return %arg0, %c0_i32 : i32, i32
  }
}

</mosaic_0001>

<bundles_post_ra>
// kernel: tpu_custom_call.1
= control target key start
LH: loop header
LB: loop body
LE: loop exit
PB: predicated region body
PF: predicated region fallthrough
CT: control target
= control target key end

     0   :  { %6 = vsyncpa [#allocation3], 0  ;;  %s106_s0 = inlined_call_operand.hbm [shape: f32[8,256], index: 0, kind: input, shape index: {}]   ;;  %s107_s1 = inlined_call_operand.hbm [shape: f32[8,256], index: 1, kind: output, shape index: {}]  }
   0x1   :  { %7 = vsyncpa [#allocation4], 0  ;;  %s88_s6 = smov [#allocation2]  }
   0x2   :  { %s14_s7 = sshll.u32 %s88_s6, 4  ;;  %s15_s7 = int_to_ptr.vmem [resolvable:$true] %s14_s7 }
   0x3   :  { %s52_s8 = scalar_lea.vmem %s15_s7, 256  ;;  %p57_p1 = scmp.lt.s32.totalorder %s15_s7, %s15_s7 }
   0x4   :  { %p53_p0 = scmp.ne.s32.totalorder %s15_s7, %s52_s8  ;;  %p58_p2 = scmp.lt.s32.totalorder %s52_s8, %s52_s8 }
   0x6   :  { %p59_p3 = por %p58_p2, %p57_p1 }
   0x8   :  { %p60_p4 = pnand %p59_p3, %p53_p0 }
   0xa   :  { %63 = shalt.err (!%p60_p4)
}
   0xb   :  { %17 = dma.hbm_to_vmem [thread:$0]  %s106_s0, 256, %s15_s7, [#allocation3]  }
   0xc   :  { %84 = dma.done.wait [#allocation3], 256  }
   0xd   :  { %85 = vsyncadd [#allocation3], 4294967040  ;;  %s89_s11 = smov [#allocation5]   ;;  %v21_v0 = vld [vmem:[#allocation2] sm:$0xff]  ;;  %v22_v1 = vld [vmem:[#allocation2 + $0x8] sm:$0xff] }
   0xe   :  { %s33_s12 = sshll.u32 %s89_s11, 4  ;;  %v23_v2 = vceil.f32 %v21_v0  ;;  %v24_v3 = vceil.f32 %v22_v1  ;;  %s34_s12 = int_to_ptr.vmem [resolvable:$true] %s33_s12 }
   0xf   :  { %s64_s13 = scalar_lea.vmem %s34_s12, 256  ;;  %p69_p6 = scmp.lt.s32.totalorder %s34_s12, %s34_s12 }
  0x10   :  { %25 = vst [vmem:[#allocation5] sm:$0xff] %v23_v2  ;;  %26 = vst [vmem:[#allocation5 + $0x8] sm:$0xff] %v24_v3  ;;  %p65_p5 = scmp.ne.s32.totalorder %s34_s12, %s64_s13  ;;  %p70_p7 = scmp.lt.s32.totalorder %s64_s13, %s64_s13 }
  0x12   :  { %p71_p8 = por %p70_p7, %p69_p6 }
  0x14   :  { %p72_p9 = pnand %p71_p8, %p65_p5 }
  0x16   :  { %75 = shalt.err (!%p72_p9)
}
  0x17   :  { %36 = dma.vmem_to_hbm [thread:$0]  %s34_s12, 256, %s107_s1, [#allocation4]  }
  0x18   :  { %86 = dma.done.wait [#allocation4], 256  }
  0x19   :  { %87 = vsyncadd [#allocation4], 4294967040 }
  0x1a   :  { %40 = vsyncpa [#allocation3], 1 }
  0x1b   :  { %41 = vsyncpa [#allocation4], 1 }

</bundles_post_ra>
